<compile_context>
chip_gen: v5e
topology: v5e:2x2
jax: 0.10.0
libtpu: 0.0.40
codegen_flags: <defaults>
</compile_context>

<pallas_src>
import functools

import jax
import jax.numpy as jnp
from jax import lax
from jax.experimental import pallas as pl
from jax.experimental.pallas import tpu as pltpu


def _round_up(x, m):
    return ((x + m - 1) // m) * m


# --------------------------------------------------------------------------- #
# Kernel
# --------------------------------------------------------------------------- #
def _conv_band_kernel(x_ref, w_ref, o_ref, *, kH, TH, stride, dilation,
                      apply_relu):
    """One (batch, row-tile) grid step.

    x_ref : (Hp, WC_in_pad)              whole padded image of this batch elem
                                         (block index constant over the row
                                          axis -> DMA'd once per n)
    w_ref : (kH, WC_in_pad, WC_out_pad)  block-banded weights (grid-invariant,
                                         single-buffered)
    o_ref : (TH, WC_out_pad)             TH output rows, lane-dense
    """
    r = pl.program_id(1)
    row0 = pl.multiple_of(r * TH * stride, TH * stride)

    def rows(kh):
        start = row0 + kh * dilation
        if stride == 1:
            return x_ref[pl.ds(start, TH), :]
        # Non-default path (module default stride=1): strided row read.
        # TODO(synk): stride>1 is implemented but not exercised by __main__.
        return x_ref[pl.ds(start, TH, stride), :]

    # f32 accumulation on the MXU; init from the first tap (no zeros broadcast,
    # no kH extra VALU add passes over the (TH, WC_out) f32 tile).
    acc = jnp.dot(rows(0), w_ref[0], preferred_element_type=jnp.float32)
    for kh in range(1, kH):                       # static unroll (kH is tiny)
        acc += jnp.dot(rows(kh), w_ref[kh], preferred_element_type=jnp.float32)

    if apply_relu:
        acc = jnp.maximum(acc, 0.0)

    o_ref[...] = acc.astype(o_ref.dtype)


# --------------------------------------------------------------------------- #
# Tiling / VMEM helpers
# --------------------------------------------------------------------------- #
def _vmem_cap_bytes():
    """Per-generation scoped-VMEM cap (~80% of physical VMEM)."""
    try:
        phys = int(pltpu.get_tpu_info().vmem_capacity_bytes)
    except Exception:
        phys = 64 << 20                      # conservative (v7x-sized) fallback
    return min(int(phys * 0.8), phys - (8 << 20))


def _pick_row_tile(h_out, dtype, row_budget, n_batch):
    """Largest legal output-row tile that fits the VMEM row budget.

    Legal = full h_out, or a divisor of h_out that keeps the sublane axis
    dense for `dtype` (8 rows for 4-byte, 16 for 2-byte, 32 for 1-byte types).
    >= 2 row tiles are only forced when n_batch == 1 so both TensorCores get
    work on v7x without shrinking the matmul M for batched inputs.
    """
    sub = max(8, 32 // max(jnp.dtype(dtype).itemsize, 1))
    legal = [h_out] + [t for t in range(h_out - 1, 0, -1)
                       if h_out % t == 0 and t % sub == 0]
    fitting = [t for t in legal if t <= row_budget] or [legal[-1]]
    if n_batch == 1:
        multi = [t for t in fitting if h_out // t >= 2]
        if multi:
            return multi[0]
    return fitting[0]


def _weight_block_spec(kH, wc_in_pad, wc_out_pad):
    """Grid-invariant weight BlockSpec, single-buffered to halve resident VMEM."""
    try:
        return pl.BlockSpec((kH, wc_in_pad, wc_out_pad), lambda n, r: (0, 0, 0),
                            pipeline_mode=pl.Buffered(1))
    except Exception:            # fall back if this BlockSpec lacks pipeline_mode
        return pl.BlockSpec((kH, wc_in_pad, wc_out_pad), lambda n, r: (0, 0, 0))


# --------------------------------------------------------------------------- #
# Wrapper
# --------------------------------------------------------------------------- #
def conv_layer_prepare(weight_oihw, *, in_width, stride=1, dilation=1):
    """Build the block-banded weight ONCE per (weight, width, stride, dilation).

    w_band[kh, w_in*C_in + ci, w_out*C_out + co] = W[co, ci, kh, kw]
        iff w_in == w_out*stride + kw*dilation, else 0,
    zero-padded so both matmul axes are multiples of 128 lanes.
    """
    C_out, C_in, kH, kW = weight_oihw.shape
    padding = (kH // 2) * dilation
    Wp = in_width + 2 * padding
    W_out = (in_width + 2 * padding - dilation * (kW - 1) - 1) // stride + 1
    WC_in, WC_out = Wp * C_in, W_out * C_out
    WC_in_pad, WC_out_pad = _round_up(WC_in, 128), _round_up(WC_out, 128)

    w_hwio = jnp.transpose(weight_oihw, (2, 3, 1, 0))        # (kH,kW,Cin,Cout)
    w_in_pos = jnp.arange(Wp)
    w_out_pos = jnp.arange(W_out)
    kw_pos = jnp.arange(kW)
    band_mask = (w_in_pos[None, :, None] ==
                 (w_out_pos[None, None, :] * stride +
                  kw_pos[:, None, None] * dilation)).astype(weight_oihw.dtype)
    # -> (kH, Wp, C_in, W_out, C_out): rows flatten as w_in*C_in+ci, columns as
    #    w_out*C_out+co, matching the x slab and the output slab layouts.
    w_band = jnp.einsum('hwic,wpo->hpioc', w_hwio, band_mask)
    w_band = w_band.reshape(kH, WC_in, WC_out)
    w_band = jnp.pad(w_band, ((0, 0), (0, WC_in_pad - WC_in),
                              (0, WC_out_pad - WC_out)))
    # TODO(synk): for very wide images the band is O(kH*Wp*W_out*Cin*Cout) and
    #             inflates MXU FLOPs ~Wp/kW; a W-tiled band (or kW lane-shifted
    #             matmuls via pltpu.roll once C_in >= 128) is needed there.
    return w_band


@functools.partial(jax.jit,
                   static_argnames=("out_channels", "stride", "dilation", "act"))
def conv_layer_apply(x_nchw, w_band, *, out_channels, stride=1, dilation=1,
                     act='relu'):
    """ConvLayer forward. x: (N, Cin, H, W); w_band from conv_layer_prepare."""
    if act not in (None, False, '', 'relu'):
        raise NotImplementedError(f"act={act!r} not supported")
    N, C_in, H, W = x_nchw.shape
    C_out = out_channels
    kH = w_band.shape[0]
    kW = kH                                         # square kernel (module API)

    padding = (kH // 2) * dilation
    H_out = (H + 2 * padding - dilation * (kH - 1) - 1) // stride + 1
    W_out = (W + 2 * padding - dilation * (kW - 1) - 1) // stride + 1
    Hp, Wp = H + 2 * padding, W + 2 * padding
    WC_in, WC_out = Wp * C_in, W_out * C_out
    WC_in_pad, WC_out_pad = _round_up(WC_in, 128), _round_up(WC_out, 128)
    assert w_band.shape == (kH, WC_in_pad, WC_out_pad), (
        "w_band does not match this input shape / stride / dilation")

    # ---- wrapper glue: NCHW -> zero-padded, lane-padded (N, Hp, WC_in_pad) --
    # TODO(synk): carrying NHWC through the surrounding model and zero-padding
    #             inside the kernel would remove these wrapper HBM passes.
    x_nhwc = jnp.transpose(x_nchw, (0, 2, 3, 1))
    x_pad = jnp.pad(x_nhwc, ((0, 0), (padding, padding),
                             (padding, padding), (0, 0)))
    x_flat = x_pad.reshape(N, Hp, WC_in)
    if WC_in_pad != WC_in:
        x_flat = jnp.pad(x_flat, ((0, 0), (0, 0), (0, WC_in_pad - WC_in)))

    # ---- tiling: biggest row tile that fits the per-generation VMEM budget --
    itm = jnp.dtype(x_nchw.dtype).itemsize
    witm = jnp.dtype(w_band.dtype).itemsize
    cap = _vmem_cap_bytes()
    fixed = (2 * Hp * WC_in_pad * itm               # input, double-buffered
             + kH * WC_in_pad * WC_out_pad * witm)  # weights, single-buffered
    per_row = 2 * WC_out_pad * itm                  # output, double-buffered
    row_budget = max((cap - fixed - (4 << 20)) // per_row, 8)
    TH = _pick_row_tile(H_out, x_nchw.dtype, row_budget, N)
    grid = (N, H_out // TH)
    vmem_limit = min(cap, max(fixed + TH * per_row + (8 << 20), 32 << 20))
    # TODO(synk): for images where 2*Hp*Wp*Cin no longer fits (v7x: 64 MiB
    #             VMEM), block the input along H with a halo instead of
    #             staging the whole padded image per batch element.

    kernel = functools.partial(_conv_band_kernel, kH=kH, TH=TH, stride=stride,
                               dilation=dilation, apply_relu=(act == 'relu'))

    out_flat = pl.pallas_call(
        kernel,
        out_shape=jax.ShapeDtypeStruct((N, H_out, WC_out_pad), x_nchw.dtype),
        grid_spec=pltpu.PrefetchScalarGridSpec(
            num_scalar_prefetch=0,
            grid=grid,
            in_specs=[
                # Whole padded image per batch element; block index constant
                # over the row axis -> fetched once per n.
                pl.BlockSpec((None, Hp, WC_in_pad), lambda n, r: (n, 0, 0)),
                # Banded weights, resident across the whole grid.
                _weight_block_spec(kH, WC_in_pad, WC_out_pad),
            ],
            # Lane-dense output row tiles (last dim padded to x128).
            out_specs=pl.BlockSpec((None, TH, WC_out_pad),
                                   lambda n, r: (n, r, 0)),
        ),
        compiler_params=pltpu.CompilerParams(
            dimension_semantics=("parallel", "parallel"),
            vmem_limit_bytes=int(vmem_limit)),
    )(x_flat, w_band)

    out = out_flat[..., :WC_out].reshape(N, H_out, W_out, C_out)
    return jnp.transpose(out, (0, 3, 1, 2))         # back to NCHW (PyTorch API)


def conv_layer_forward(x_nchw, weight_oihw, *, stride=1, dilation=1, act='relu'):
    """Convenience wrapper matching the PyTorch module call (rebuilds the band
    each call; prefer conv_layer_prepare + conv_layer_apply for fixed weights)."""
    w_band = conv_layer_prepare(weight_oihw, in_width=x_nchw.shape[-1],
                                stride=stride, dilation=dilation)
    return conv_layer_apply(x_nchw, w_band, out_channels=weight_oihw.shape[0],
                            stride=stride, dilation=dilation, act=act)


# --------------------------------------------------------------------------- #
# Reference + self-check
# --------------------------------------------------------------------------- #
def _reference(x_nchw, weight_oihw, *, stride, dilation, act):
    padding = (weight_oihw.shape[2] // 2) * dilation
    out = lax.conv_general_dilated(
        x_nchw.astype(jnp.float32), weight_oihw.astype(jnp.float32),
        window_strides=(stride, stride),
        padding=((padding, padding), (padding, padding)),
        rhs_dilation=(dilation, dilation),
        dimension_numbers=('NCHW', 'OIHW', 'NCHW'))
    if act == 'relu':
        out = jnp.maximum(out, 0.0)
    return out


if __name__ == "__main__":
    key = jax.random.PRNGKey(0)
    k1, k2, k3, k4 = jax.random.split(key, 4)

    # --- ConvLayer defaults: in_dim=4, out_dim=8, k=3, s=1, d=1, relu --------
    N, C_in, H, W = 2, 4, 16, 16
    C_out, ksz = 8, 3
    x = jax.random.normal(k1, (N, C_in, H, W), dtype=jnp.float32)
    bound = 1.0 / ((C_in * ksz * ksz) ** 0.5)
    w = jax.random.uniform(k2, (C_out, C_in, ksz, ksz),
                           minval=-bound, maxval=bound, dtype=jnp.float32)

    w_band = conv_layer_prepare(w, in_width=W, stride=1, dilation=1)
    out = jax.block_until_ready(
        conv_layer_apply(x, w_band, out_channels=C_out, stride=1, dilation=1,
                         act='relu'))
    ref = _reference(x, w, stride=1, dilation=1, act='relu')
    assert out.shape == (N, C_out, H, W)
    assert jnp.allclose(out, ref, atol=1e-4, rtol=1e-4)

    # --- non-default shape: N=1, Cin=3, Cout=6, dilation=2 -------------------
    # Exercises lane padding (+ output slice), the N==1 row tiling used for
    # megacore, and the dilation path.
    N2, C_in2, C_out2 = 1, 3, 6
    x2 = jax.random.normal(k3, (N2, C_in2, H, W), dtype=jnp.float32)
    bound2 = 1.0 / ((C_in2 * ksz * ksz) ** 0.5)
    w2 = jax.random.uniform(k4, (C_out2, C_in2, ksz, ksz),
                            minval=-bound2, maxval=bound2, dtype=jnp.float32)
    w2_band = conv_layer_prepare(w2, in_width=W, stride=1, dilation=2)
    out2 = jax.block_until_ready(
        conv_layer_apply(x2, w2_band, out_channels=C_out2, stride=1,
                         dilation=2, act='relu'))
    ref2 = _reference(x2, w2, stride=1, dilation=2, act='relu')
    assert out2.shape == ref2.shape
    assert jnp.allclose(out2, ref2, atol=1e-4, rtol=1e-4)

    print("KERNEL_OK")
</pallas_src>

<mosaic_0001>
module attributes {stable_mosaic.version = 11 : i64} {
  func.func @_conv_band_kernel(%arg0: i32, %arg1: i32, %arg2: memref<1x18x128xf32, #tpu.memory_space<vmem>>, %arg3: memref<3x128x128xf32, #tpu.memory_space<vmem>>, %arg4: memref<1x16x128xf32, #tpu.memory_space<vmem>>) attributes {dimension_semantics = [#tpu.dimension_semantics<parallel>, #tpu.dimension_semantics<parallel>], iteration_bounds = array<i64: 2, 1>, scalar_prefetch = 0 : i64, scratch_operands = 0 : i64, tpu.core_type = #tpu.core_type<tc>, window_params = [{transform_indices = @transform_0, window_bounds = array<i64: 1, 18, 128>}, {pipeline_mode = #tpu.pipeline_mode<synchronous>, transform_indices = @transform_1, window_bounds = array<i64: 3, 128, 128>}, {transform_indices = @transform_2, window_bounds = array<i64: 1, 16, 128>}]} {
    %c16_i32 = arith.constant 16 : i32
    %0 = arith.muli %arg1, %c16_i32 : i32
    %c1_i32 = arith.constant 1 : i32
    %1 = arith.muli %0, %c1_i32 : i32
    %2 = tpu.assume_multiple %1, 16 : i32
    %c0_i32 = arith.constant 0 : i32
    %3 = arith.addi %2, %c0_i32 : i32
    %c0 = arith.constant 0 : index
    %4 = arith.index_cast %3 : i32 to index
    %c0_0 = arith.constant 0 : index
    %5 = vector.load %arg2[%c0, %4, %c0_0] : memref<1x18x128xf32, #tpu.memory_space<vmem>>, vector<1x16x128xf32>
    %6 = vector.shape_cast %5 : vector<1x16x128xf32> to vector<16x128xf32>
    %c0_1 = arith.constant 0 : index
    %c0_2 = arith.constant 0 : index
    %c0_3 = arith.constant 0 : index
    %7 = vector.load %arg3[%c0_1, %c0_2, %c0_3] : memref<3x128x128xf32, #tpu.memory_space<vmem>>, vector<1x128x128xf32>
    %8 = vector.shape_cast %7 : vector<1x128x128xf32> to vector<128x128xf32>
    %cst = arith.constant dense<0.000000e+00> : vector<16x128xf32>
    %9 = tpu.matmul %6, %8, %cst {dimension_numbers = #tpu.dot_dimension_numbers<[1], [0], [0], [1], [0, 0, 1, 1], [], []>} : vector<16x128xf32>, vector<128x128xf32>, vector<16x128xf32> -> vector<16x128xf32>
    %c1_i32_4 = arith.constant 1 : i32
    %10 = arith.addi %2, %c1_i32_4 : i32
    %c0_5 = arith.constant 0 : index
    %11 = arith.index_cast %10 : i32 to index
    %c0_6 = arith.constant 0 : index
    %12 = vector.load %arg2[%c0_5, %11, %c0_6] : memref<1x18x128xf32, #tpu.memory_space<vmem>>, vector<1x16x128xf32>
    %13 = vector.shape_cast %12 : vector<1x16x128xf32> to vector<16x128xf32>
    %c1 = arith.constant 1 : index
    %c0_7 = arith.constant 0 : index
    %c0_8 = arith.constant 0 : index
    %14 = vector.load %arg3[%c1, %c0_7, %c0_8] : memref<3x128x128xf32, #tpu.memory_space<vmem>>, vector<1x128x128xf32>
    %15 = vector.shape_cast %14 : vector<1x128x128xf32> to vector<128x128xf32>
    %cst_9 = arith.constant dense<0.000000e+00> : vector<16x128xf32>
    %16 = tpu.matmul %13, %15, %cst_9 {dimension_numbers = #tpu.dot_dimension_numbers<[1], [0], [0], [1], [0, 0, 1, 1], [], []>} : vector<16x128xf32>, vector<128x128xf32>, vector<16x128xf32> -> vector<16x128xf32>
    %17 = arith.addf %9, %16 : vector<16x128xf32>
    %c2_i32 = arith.constant 2 : i32
    %18 = arith.addi %2, %c2_i32 : i32
    %c0_10 = arith.constant 0 : index
    %19 = arith.index_cast %18 : i32 to index
    %c0_11 = arith.constant 0 : index
    %20 = vector.load %arg2[%c0_10, %19, %c0_11] : memref<1x18x128xf32, #tpu.memory_space<vmem>>, vector<1x16x128xf32>
    %21 = vector.shape_cast %20 : vector<1x16x128xf32> to vector<16x128xf32>
    %c2 = arith.constant 2 : index
    %c0_12 = arith.constant 0 : index
    %c0_13 = arith.constant 0 : index
    %22 = vector.load %arg3[%c2, %c0_12, %c0_13] : memref<3x128x128xf32, #tpu.memory_space<vmem>>, vector<1x128x128xf32>
    %23 = vector.shape_cast %22 : vector<1x128x128xf32> to vector<128x128xf32>
    %cst_14 = arith.constant dense<0.000000e+00> : vector<16x128xf32>
    %24 = tpu.matmul %21, %23, %cst_14 {dimension_numbers = #tpu.dot_dimension_numbers<[1], [0], [0], [1], [0, 0, 1, 1], [], []>} : vector<16x128xf32>, vector<128x128xf32>, vector<16x128xf32> -> vector<16x128xf32>
    %25 = arith.addf %17, %24 : vector<16x128xf32>
    %cst_15 = arith.constant 0.000000e+00 : f32
    %26 = vector.broadcast %cst_15 : f32 to vector<16x128xf32>
    %27 = arith.maximumf %25, %26 : vector<16x128xf32>
    %c0_16 = arith.constant 0 : index
    %c0_17 = arith.constant 0 : index
    %c0_18 = arith.constant 0 : index
    %28 = vector.load %arg4[%c0_16, %c0_17, %c0_18] : memref<1x16x128xf32, #tpu.memory_space<vmem>>, vector<1x16x128xf32>
    %29 = vector.shape_cast %28 : vector<1x16x128xf32> to vector<16x128xf32>
    %30 = vector.shape_cast %27 : vector<16x128xf32> to vector<1x16x128xf32>
    tpu.vector_store %arg4[%c0_16, %c0_17, %c0_18], %30 {strides = array<i32>} : memref<1x16x128xf32, #tpu.memory_space<vmem>>, vector<1x16x128xf32>,
    return
  }
  func.func @transform_0(%arg0: i32, %arg1: i32) -> (i32, i32, i32) {
    %c0_i32 = arith.constant 0 : i32
    %c0_i32_0 = arith.constant 0 : i32
    %c0_i32_1 = arith.constant 0 : i32
    return %arg0, %c0_i32, %c0_i32_0 : i32, i32, i32
  }
  func.func @transform_1(%arg0: i32, %arg1: i32) -> (i32, i32, i32) {
    %c0_i32 = arith.constant 0 : i32
    %c0_i32_0 = arith.constant 0 : i32
    %c0_i32_1 = arith.constant 0 : i32
    %c0_i32_2 = arith.constant 0 : i32
    return %c0_i32, %c0_i32_0, %c0_i32_1 : i32, i32, i32
  }
  func.func @transform_2(%arg0: i32, %arg1: i32) -> (i32, i32, i32) {
    %c0_i32 = arith.constant 0 : i32
    %c0_i32_0 = arith.constant 0 : i32
    return %arg0, %arg1, %c0_i32 : i32, i32, i32
  }
}

</mosaic_0001>

<bundles_post_ra>
// kernel: conv_layer_apply.1
= control target key start
LH: loop header
LB: loop body
LE: loop exit
PB: predicated region body
PF: predicated region fallthrough
CT: control target
= control target key end

     0   :  { %s520_s9 = smov 0   ;;  %s522_s10 = smov 0   ;;  %s707_s0 = inlined_call_operand.vmem [shape: f32[2,18,128], index: 0, kind: input, shape index: {}]   ;;  %s708_s1 = inlined_call_operand.vmem [shape: f32[3,128,128], index: 1, kind: input, shape index: {}]   ;;  %s709_s2 = inlined_call_operand.vmem [shape: f32[2,16,128], index: 2, kind: output, shape index: {}]  }
   0x1   :  { %s524_s11 = smov 0  }
   0x2 LB: > { %s24_s12 = sadd.s32 1, %s499_s10  ;;  %p397_p0 = scmp.ge.s32.totalorder %s503_s11, 1  ;;  %s503_s11 = sphi %s524_s11, %s12_s11   ;;  %s499_s10 = sphi %s522_s10, %s711_s10   ;;  %s495_s9 = sphi %s520_s9, %s710_s9  }
   0x3   : > { %p26_p1 = scmp.ge.s32.totalorder %s24_s12, 2  ;;  %p126_p2 = scmp.lt.s32.totalorder %s503_s11, 3 }
   0x5   : > { %s713_s12 = smov (%p26_p1, %s24_s12), 0  ;;  %p127_p3 = pnand %p397_p0, %p126_p2 }
   0x6   : > { %p152_p4 = scmp.lt.s32.totalorder (!%p127_p3), %s495_s9, 1 }
   0x7   : > { %130 = sbr.rel (%p127_p3) target bundleno = 189 (0xbd), region = 28 }
   0xc   : > { %v436_v0 = vld [vmem:[%s708_s1 + $0x178] sm:$0xff]  ;;  %v435_v1 = vld [vmem:[%s708_s1 + $0x170] sm:$0xff]  ;;  %v434_v5 = vld [vmem:[%s708_s1 + $0x168] sm:$0xff]  ;;  %s715_s9 = smov (!%p152_p4, %s495_s9), 1 }
   0xd   : > { %v418_v2 = vld [vmem:[%s708_s1 + $0xf8] sm:$0xff]  ;;  %275 = vmatpush.msra.mxu2 %v436_v0  ;;  %v417_v4 = vld [vmem:[%s708_s1 + $0xf0] sm:$0xff]  ;;  %v416_v7 = vld [vmem:[%s708_s1 + $0xe8] sm:$0xff]  ;;  %s456_s17 = smul.u32 24, %s715_s9 }
   0xe   : > { %208 = vmatpush.msra.mxu0 %v418_v2  ;;  %v186_v3 = vld [vmem:[%s708_s1 + $0x78] sm:$0xff]  ;;  %440 = vmatpush.msra.mxu3 %v418_v2  ;;  %v185_v6 = vld [vmem:[%s708_s1 + $0x70] sm:$0xff]  ;;  %v184_v8 = vld [vmem:[%s708_s1 + $0x68] sm:$0xff] }
   0xf   : > { %231 = vmatpush.msra.mxu1 %v186_v3  ;;  %276 = vmatpush.msra.mxu2 %v435_v1  ;;  %v433_v9 = vld [vmem:[%s708_s1 + $0x160] sm:$0xff]  ;;  %v432_v12 = vld [vmem:[%s708_s1 + $0x158] sm:$0xff]  ;;  %v431_v15 = vld [vmem:[%s708_s1 + $0x150] sm:$0xff]  ;;  %s156_s30 = scalar_lea.vmem %s707_s0, %s456_s17  ;;  %s439_s17 = sshll.u32 %s715_s9, 4 }
  0x10   : > { %209 = vmatpush.msra.mxu0 %v417_v4  ;;  %441 = vmatpush.msra.mxu3 %v417_v4  ;;  %v415_v10 = vld [vmem:[%s708_s1 + $0xe0] sm:$0xff]  ;;  %v414_v13 = vld [vmem:[%s708_s1 + $0xd8] sm:$0xff]  ;;  %v413_v16 = vld [vmem:[%s708_s1 + $0xd0] sm:$0xff]  ;;  %s165_s20 = scalar_lea.vmem %s709_s2, %s439_s17 }
  0x11   : > { %232 = vmatpush.msra.mxu1 %v185_v6  ;;  %277 = vmatpush.msra.mxu2 %v434_v5  ;;  %v183_v11 = vld [vmem:[%s708_s1 + $0x60] sm:$0xff]  ;;  %v182_v14 = vld [vmem:[%s708_s1 + $0x58] sm:$0xff]  ;;  %v181_v17 = vld [vmem:[%s708_s1 + $0x50] sm:$0xff] }
  0x12   : > { %210 = vmatpush.msra.mxu0 %v416_v7  ;;  %442 = vmatpush.msra.mxu3 %v416_v7  ;;  %v430_v18 = vld [vmem:[%s708_s1 + $0x148] sm:$0xff]  ;;  %v429_v21 = vld [vmem:[%s708_s1 + $0x140] sm:$0xff]  ;;  %v428_v24 = vld [vmem:[%s708_s1 + $0x138] sm:$0xff] }
  0x13   : > { %233 = vmatpush.msra.mxu1 %v184_v8  ;;  %278 = vmatpush.msra.mxu2 %v433_v9  ;;  %v412_v19 = vld [vmem:[%s708_s1 + $0xc8] sm:$0xff]  ;;  %v411_v22 = vld [vmem:[%s708_s1 + $0xc0] sm:$0xff]  ;;  %v410_v25 = vld [vmem:[%s708_s1 + $0xb8] sm:$0xff] }
  0x14   : > { %211 = vmatpush.msra.mxu0 %v415_v10  ;;  %443 = vmatpush.msra.mxu3 %v415_v10  ;;  %v180_v20 = vld [vmem:[%s708_s1 + $0x48] sm:$0xff]  ;;  %v179_v23 = vld [vmem:[%s708_s1 + $0x40] sm:$0xff]  ;;  %v178_v26 = vld [vmem:[%s708_s1 + $0x38] sm:$0xff] }
  0x15   : > { %234 = vmatpush.msra.mxu1 %v183_v11  ;;  %279 = vmatpush.msra.mxu2 %v432_v12  ;;  %v427_v27 = vld [vmem:[%s708_s1 + $0x130] sm:$0xff]  ;;  %v426_v30 = vld [vmem:[%s708_s1 + $0x128] sm:$0xff]  ;;  %v425_v33 = vld [vmem:[%s708_s1 + $0x120] sm:$0xff] }
  0x16   : > { %212 = vmatpush.msra.mxu0 %v414_v13  ;;  %444 = vmatpush.msra.mxu3 %v414_v13  ;;  %v409_v28 = vld [vmem:[%s708_s1 + $0xb0] sm:$0xff]  ;;  %v408_v31 = vld [vmem:[%s708_s1 + $0xa8] sm:$0xff]  ;;  %v407_v34 = vld [vmem:[%s708_s1 + $0xa0] sm:$0xff] }
  0x17   : > { %235 = vmatpush.msra.mxu1 %v182_v14  ;;  %280 = vmatpush.msra.mxu2 %v431_v15  ;;  %v177_v29 = vld [vmem:[%s708_s1 + $0x30] sm:$0xff]  ;;  %v176_v32 = vld [vmem:[%s708_s1 + $0x28] sm:$0xff]  ;;  %v175_v35 = vld [vmem:[%s708_s1 + $0x20] sm:$0xff] }
  0x18   : > { %213 = vmatpush.msra.mxu0 %v413_v16  ;;  %445 = vmatpush.msra.mxu3 %v413_v16  ;;  %v424_v36 = vld [vmem:[%s708_s1 + $0x118] sm:$0xff]  ;;  %v423_v39 = vld [vmem:[%s708_s1 + $0x110] sm:$0xff]  ;;  %v422_v42 = vld [vmem:[%s708_s1 + $0x108] sm:$0xff] }
  0x19   : > { %236 = vmatpush.msra.mxu1 %v181_v17  ;;  %281 = vmatpush.msra.mxu2 %v430_v18  ;;  %v406_v37 = vld [vmem:[%s708_s1 + $0x98] sm:$0xff]  ;;  %v405_v40 = vld [vmem:[%s708_s1 + $0x90] sm:$0xff]  ;;  %v404_v43 = vld [vmem:[%s708_s1 + $0x88] sm:$0xff] }
  0x1a   : > { %214 = vmatpush.msra.mxu0 %v412_v19  ;;  %446 = vmatpush.msra.mxu3 %v412_v19  ;;  %v174_v38 = vld [vmem:[%s708_s1 + $0x18] sm:$0xff]  ;;  %v173_v41 = vld [vmem:[%s708_s1 + $0x10] sm:$0xff]  ;;  %v172_v44 = vld [vmem:[%s708_s1 + $0x8] sm:$0xff] }
  0x1b   : > { %237 = vmatpush.msra.mxu1 %v180_v20  ;;  %282 = vmatpush.msra.mxu2 %v429_v21  ;;  %v421_v45 = vld [vmem:[%s708_s1 + $0x100] sm:$0xff]  ;;  %v402_v51 = vld [vmem:[%s156_s30 + $0x9] sm:$0xff] }
  0x1c   : > { %215 = vmatpush.msra.mxu0 %v411_v22  ;;  %447 = vmatpush.msra.mxu3 %v411_v22  ;;  %v403_v46 = vld [vmem:[%s708_s1 + $0x80] sm:$0xff]  ;;  %v420_v52 = vld [vmem:[%s156_s30 + $0xa] sm:$0xff] }
  0x1d   : > { %238 = vmatpush.msra.mxu1 %v179_v23  ;;  %283 = vmatpush.msra.mxu2 %v428_v24  ;;  %v419_v47 = vld [vmem:[%s156_s30 + $0x2] sm:$0xff] }
  0x1e   : > { %216 = vmatpush.msra.mxu0 %v410_v25  ;;  %448 = vmatpush.msra.mxu3 %v410_v25  ;;  %v171_v48 = vld [vmem:[%s708_s1] sm:$0xff]  ;;  %v170_v53 = vld [vmem:[%s156_s30 + $0x8] sm:$0xff] }
  0x1f   : > { %239 = vmatpush.msra.mxu1 %v178_v26  ;;  %284 = vmatpush.msra.mxu2 %v427_v27  ;;  %v401_v49 = vld [vmem:[%s156_s30 + $0x1] sm:$0xff] }
  0x20   : > { %217 = vmatpush.msra.mxu0 %v409_v28  ;;  %449 = vmatpush.msra.mxu3 %v409_v28  ;;  %v169_v50 = vld [vmem:[%s156_s30] sm:$0xff] }
  0x21   : > { %240 = vmatpush.msra.mxu1 %v177_v29  ;;  %285 = vmatpush.msra.mxu2 %v426_v30 }
  0x22   : > { %218 = vmatpush.msra.mxu0 %v408_v31  ;;  %450 = vmatpush.msra.mxu3 %v408_v31 }
  0x23   : > { %241 = vmatpush.msra.mxu1 %v176_v32  ;;  %286 = vmatpush.msra.mxu2 %v425_v33 }
  0x24   : > { %219 = vmatpush.msra.mxu0 %v407_v34  ;;  %451 = vmatpush.msra.mxu3 %v407_v34 }
  0x25   : > { %242 = vmatpush.msra.mxu1 %v175_v35  ;;  %287 = vmatpush.msra.mxu2 %v424_v36 }
  0x26   : > { %220 = vmatpush.msra.mxu0 %v406_v37  ;;  %452 = vmatpush.msra.mxu3 %v406_v37 }
  0x27   : > { %243 = vmatpush.msra.mxu1 %v174_v38  ;;  %288 = vmatpush.msra.mxu2 %v423_v39 }
  0x28   : > { %221 = vmatpush.msra.mxu0 %v405_v40  ;;  %453 = vmatpush.msra.mxu3 %v405_v40 }
  0x29   : > { %244 = vmatpush.msra.mxu1 %v173_v41  ;;  %289 = vmatpush.msra.mxu2 %v422_v42 }
  0x2a   : > { %222 = vmatpush.msra.mxu0 %v404_v43  ;;  %454 = vmatpush.msra.mxu3 %v404_v43 }
  0x2b   : > { %245 = vmatpush.msra.mxu1 %v172_v44  ;;  %290 = vmatpush.msra.mxu2 %v421_v45 }
  0x2c   : > { %223 = vmatpush.msra.mxu0 %v403_v46  ;;  %291 = vmatmul.f32.vlgmr.msra.gmra.mxu2 %v419_v47 }
  0x2d   : > { %246 = vmatpush.msra.mxu1 %v171_v48  ;;  %224 = vmatmul.f32.vlgmr.msra.gmra.mxu0 %v401_v49 }
  0x2e   : > { %247 = vmatmul.f32.vlgmr.msra.gmra.mxu1 %v169_v50  ;;  %455 = vmatpush.msra.mxu3 %v403_v46 }
  0x2f   : > { %227 = vmatmul.f32.vlgmr.msra.gmra.mxu3 %v402_v51 }
  0x34   : > { %294 = vmatmul.f32.gmra.mxu2 %v420_v52 }
  0x36   : > { %250 = vmatmul.f32.gmra.mxu1 %v170_v53 }
  0xaa   : > { %v225_v54 = vpop.f32.mrf.mxu0 }
  0xab   : > { %v248_v55 = vpop.f32.mrf.mxu1 }
  0xac   : > { %v249_v56 = vadd.f32 %v248_v55, %v225_v54 }
  0xaf   : > { %v292_v57 = vpop.f32.mrf.mxu2 }
  0xb0   : > { %v298_v58 = vadd.f32 %v292_v57, %v249_v56 }
  0xb2   : > { %v300_v59 = vmax.f32 %v298_v58, 0.0  ;;  %v228_v60 = vpop.f32.mrf.mxu3 }
  0xb3   : > { %v251_v61 = vpop.f32.mrf.mxu1 }
  0xb4   : > { %302 = vst [vmem:[%s165_s20] sm:$0xff] %v300_v59  ;;  %v252_v62 = vadd.f32 %v251_v61, %v228_v60 }
  0xb7   : > { %v295_v63 = vpop.f32.mrf.mxu2 }
  0xb8   : > { %v299_v0 = vadd.f32 %v295_v63, %v252_v62 }
  0xba   : > { %v301_v1 = vmax.f32 %v299_v0, 0.0 }
  0xbc   : > { %303 = vst [vmem:[%s165_s20 + $0x8] sm:$0xff] %v301_v1 }
  0xbd PF: > { %s12_s11 = sadd.s32 1, %s503_s11   ;;  %s710_s9 = smov %s499_s10 }
  0xbe   : > { %p9_p5 = scmp.ge.s32.totalorder %s12_s11, 4   ;;  %s711_s10 = smov %s713_s12 }
  0xc0   :  { %11 = sbr.rel (!%p9_p5) target bundleno = 2 (0x2), region = 63 }

</bundles_post_ra>
